<compile_context>
chip_gen: v6e
topology: v6e:2x2x1
jax: 0.10.0
libtpu: 0.0.40
codegen_flags: <defaults>
</compile_context>

<pallas_src>
import jax
import jax.numpy as jnp
from jax.experimental import pallas as pl
from jax.experimental.pallas import tpu as pltpu


def _cdiv(a, b):
    return -(-a // b)


def _round_up(a, m):
    return _cdiv(a, m) * m


def _make_pool_kernel(c, thw, hw, num_k_per_split, needs_mask):
    """Streaming global-sum over the spatial (HW) axis.

    x_ref: (1, C, thw)   one batch element, one spatial tile (native dtype)
    o_ref: (1, 1, 1, C)  f32 partial sum for this (split, batch); resident
                         across the innermost grid axis (accumulator).
    """

    def pool_sum_kernel(x_ref, o_ref):
        s = pl.program_id(0)
        k = pl.program_id(2)

        @pl.when(k == 0)
        def _init():
            o_ref[...] = jnp.zeros_like(o_ref)

        # Upcast AFTER the load so the DMA moves the native (possibly bf16) bytes.
        xf = x_ref[...].astype(jnp.float32)                     # (1, C, thw)

        if needs_mask:
            # Ragged tail: the edge DMA is clamped and the unfilled VMEM region
            # holds stale data -> mask against the true remaining length.
            start = (s * num_k_per_split + k) * thw
            valid = hw - start                                   # may be < thw
            lane = jax.lax.broadcasted_iota(jnp.int32, xf.shape, 2)
            xf = jnp.where(lane < valid, xf, 0.0)

        o_ref[...] += jnp.sum(xf, axis=-1).reshape(1, 1, 1, c)

    return pool_sum_kernel


def ca_attention_pallas(x, w1, b1, w2, b2, *, target_block_bytes=4 * 1024 * 1024):
    """Channel-attention weights of CALayer.

    x: (B, C, H, W) (any float dtype); w1: (Cr, C); b1: (Cr,); w2: (C, Cr); b2: (C,).
    Returns sigmoid attention weights of shape (B, C, 1, 1), float32.
    """
    B, C, H, W = x.shape
    HW = H * W
    itemsize = jnp.dtype(x.dtype).itemsize
    x_flat = x.reshape(B, C, HW)                                 # free reshape, native dtype

    # ---- tile-size selection: byte budget, 128-lane aligned, balanced tail ----
    hw_ceil = _round_up(HW, 128)
    cap = max(128, (target_block_bytes // (C * itemsize)) // 128 * 128)
    cap = min(cap, hw_ceil)

    num_splits = 1
    if HW <= cap:
        thw, num_k = HW, 1                                       # block == full dim, no mask
    else:
        num_k = _cdiv(HW, cap)
        thw = _round_up(_cdiv(HW, num_k), 128)                   # balanced tiles
        num_k = _cdiv(HW, thw)
        if B == 1 and num_k >= 2:
            # Split the reduction across two "parallel" grid slots so a v7x
            # megacore uses both TensorCores' HBM bandwidth.  Guard against
            # fully out-of-bounds tiles (partially ragged tiles are masked).
            nk2 = num_k + (num_k % 2)                            # even tile count
            thw2 = _round_up(_cdiv(HW, nk2), 128)
            if (nk2 - 1) * thw2 < HW:
                num_splits, num_k, thw = 2, nk2, thw2

    num_k_per_split = num_k // num_splits
    needs_mask = (num_splits * num_k_per_split * thw) != HW

    kernel = _make_pool_kernel(C, thw, HW, num_k_per_split, needs_mask)

    # ---- stage 1: tiled streaming global-sum pool (HBM-bandwidth bound) ------
    partials = pl.pallas_call(
        kernel,
        out_shape=jax.ShapeDtypeStruct((num_splits, B, 1, C), jnp.float32),
        grid=(num_splits, B, num_k_per_split),
        in_specs=[
            pl.BlockSpec((1, C, thw),
                         lambda s, b, k: (b, 0, s * num_k_per_split + k)),
        ],
        out_specs=pl.BlockSpec((1, 1, 1, C), lambda s, b, k: (s, b, 0, 0)),
        compiler_params=pltpu.CompilerParams(
            dimension_semantics=("parallel", "parallel", "arbitrary")),
    )(x_flat)                                                    # (S, B, 1, C) f32 sums

    # ---- stage 2: combine partials + 1x1-conv MLP (negligible FLOPs, plain jnp)
    pooled = partials.sum(axis=0).reshape(B, C) * jnp.float32(1.0 / HW)   # (B, C) means
    h = jnp.maximum(pooled @ w1.T + b1, 0.0)                              # (B, Cr) ReLU
    y = jax.nn.sigmoid(h @ w2.T + b2)                                     # (B, C) Sigmoid
    return y.astype(jnp.float32).reshape(B, C, 1, 1)


def ca_layer_pallas(x, w1, b1, w2, b2, **kw):
    """Full CALayer forward: x * channel-attention(x)."""
    y = ca_attention_pallas(x, w1, b1, w2, b2, **kw)
    return x * y.astype(x.dtype)


# ---------------------------- plain-JAX references ----------------------------
def ca_attention_ref(x, w1, b1, w2, b2):
    pooled = jnp.mean(x.astype(jnp.float32), axis=(2, 3))       # (B, C)
    h = jnp.maximum(pooled @ w1.astype(jnp.float32).T + b1.astype(jnp.float32), 0.0)
    y = jax.nn.sigmoid(h @ w2.astype(jnp.float32).T + b2.astype(jnp.float32))
    return y.reshape(x.shape[0], x.shape[1], 1, 1)


def ca_layer_ref(x, w1, b1, w2, b2):
    return x * ca_attention_ref(x, w1, b1, w2, b2).astype(x.dtype)


if __name__ == "__main__":
    key = jax.random.PRNGKey(0)
    kx, k1, k2, k3, k4, kx2, kx3, k5, k6, k7, k8 = jax.random.split(key, 11)

    # ---- case 1: default block budget, single tile, B parallel ----
    B, C, H, W = 2, 16, 16, 16
    Cr = C // 4
    x = jax.random.normal(kx, (B, C, H, W), dtype=jnp.float32)
    w1 = jax.random.normal(k1, (Cr, C), dtype=jnp.float32) * 0.1
    b1 = jax.random.normal(k2, (Cr,), dtype=jnp.float32) * 0.1
    w2 = jax.random.normal(k3, (C, Cr), dtype=jnp.float32) * 0.1
    b2 = jax.random.normal(k4, (C,), dtype=jnp.float32) * 0.1

    att = jax.block_until_ready(ca_attention_pallas(x, w1, b1, w2, b2))
    assert att.shape == (B, C, 1, 1)
    assert jnp.allclose(att, ca_attention_ref(x, w1, b1, w2, b2), atol=1e-5, rtol=1e-5)

    out = jax.block_until_ready(ca_layer_pallas(x, w1, b1, w2, b2))
    assert jnp.allclose(out, ca_layer_ref(x, w1, b1, w2, b2), atol=1e-5, rtol=1e-5)

    # ---- case 2: bf16 streaming + ragged tail masking (forced small blocks) ----
    xb = jax.random.normal(kx2, (2, 16, 18, 18), dtype=jnp.bfloat16)   # HW=324, thw=128 -> 3 tiles
    att_b = jax.block_until_ready(
        ca_attention_pallas(xb, w1, b1, w2, b2, target_block_bytes=4096))
    assert jnp.allclose(att_b, ca_attention_ref(xb, w1, b1, w2, b2), atol=1e-4, rtol=1e-4)

    # ---- case 3: B == 1 -> HW split across two "parallel" slots (v7x megacore) ----
    C1 = 8
    Cr1 = C1 // 4
    x1 = jax.random.normal(kx3, (1, C1, 32, 32), dtype=jnp.float32)    # HW=1024, thw=256, 2 splits
    w1b = jax.random.normal(k5, (Cr1, C1), dtype=jnp.float32) * 0.1
    b1b = jax.random.normal(k6, (Cr1,), dtype=jnp.float32) * 0.1
    w2b = jax.random.normal(k7, (C1, Cr1), dtype=jnp.float32) * 0.1
    b2b = jax.random.normal(k8, (C1,), dtype=jnp.float32) * 0.1
    att_1 = jax.block_until_ready(
        ca_attention_pallas(x1, w1b, b1b, w2b, b2b, target_block_bytes=8192))
    assert jnp.allclose(att_1, ca_attention_ref(x1, w1b, b1b, w2b, b2b), atol=1e-5, rtol=1e-5)

    print("KERNEL_OK")
</pallas_src>

<mosaic_0001>
module attributes {stable_mosaic.version = 11 : i64} {
  func.func @pool_sum_kernel(%arg0: i32, %arg1: i32, %arg2: i32, %arg3: memref<1x16x256xf32, #tpu.memory_space<vmem>>, %arg4: memref<1x1x1x16xf32, #tpu.memory_space<vmem>>) attributes {dimension_semantics = [#tpu.dimension_semantics<parallel>, #tpu.dimension_semantics<parallel>, #tpu.dimension_semantics<arbitrary>], iteration_bounds = array<i64: 1, 2, 1>, scalar_prefetch = 0 : i64, scratch_operands = 0 : i64, tpu.core_type = #tpu.core_type<tc>, window_params = [{transform_indices = @transform_0, window_bounds = array<i64: 1, 16, 256>}, {transform_indices = @transform_1, window_bounds = array<i64: 1, 1, 1, 16>}]} {
    %c0_i32 = arith.constant 0 : i32
    %0 = arith.cmpi eq, %arg2, %c0_i32 : i32
    %1 = arith.extui %0 : i1 to i32
    %c0_i32_0 = arith.constant 0 : i32
    %2 = arith.cmpi ne, %1, %c0_i32_0 : i32
    scf.if %2 {
      %cst_11 = arith.constant 0.000000e+00 : f32
      %9 = vector.broadcast %cst_11 : f32 to vector<1x1x1x16xf32>
      %c0_12 = arith.constant 0 : index
      %c0_13 = arith.constant 0 : index
      %c0_14 = arith.constant 0 : index
      %c0_15 = arith.constant 0 : index
      %10 = vector.load %arg4[%c0_12, %c0_13, %c0_14, %c0_15] : memref<1x1x1x16xf32, #tpu.memory_space<vmem>>, vector<1x1x1x16xf32>
      tpu.vector_store %arg4[%c0_12, %c0_13, %c0_14, %c0_15], %9 {strides = array<i32>} : memref<1x1x1x16xf32, #tpu.memory_space<vmem>>, vector<1x1x1x16xf32>,
    } else {
    }
    %c0 = arith.constant 0 : index
    %c0_1 = arith.constant 0 : index
    %c0_2 = arith.constant 0 : index
    %3 = vector.load %arg3[%c0, %c0_1, %c0_2] : memref<1x16x256xf32, #tpu.memory_space<vmem>>, vector<1x16x256xf32>
    %c0_3 = arith.constant 0 : index
    %c0_4 = arith.constant 0 : index
    %c0_5 = arith.constant 0 : index
    %c0_6 = arith.constant 0 : index
    %4 = vector.load %arg4[%c0_3, %c0_4, %c0_5, %c0_6] : memref<1x1x1x16xf32, #tpu.memory_space<vmem>>, vector<1x1x1x16xf32>
    %cst = arith.constant dense<0.000000e+00> : vector<1x16xf32>
    %5 = vector.multi_reduction <add>, %3, %cst [2] : vector<1x16x256xf32> to vector<1x16xf32>
    %6 = vector.shape_cast %5 : vector<1x16xf32> to vector<1x1x1x16xf32>
    %7 = arith.addf %4, %6 : vector<1x1x1x16xf32>
    %c0_7 = arith.constant 0 : index
    %c0_8 = arith.constant 0 : index
    %c0_9 = arith.constant 0 : index
    %c0_10 = arith.constant 0 : index
    %8 = vector.load %arg4[%c0_7, %c0_8, %c0_9, %c0_10] : memref<1x1x1x16xf32, #tpu.memory_space<vmem>>, vector<1x1x1x16xf32>
    tpu.vector_store %arg4[%c0_7, %c0_8, %c0_9, %c0_10], %7 {strides = array<i32>} : memref<1x1x1x16xf32, #tpu.memory_space<vmem>>, vector<1x1x1x16xf32>,
    return
  }
  func.func @transform_0(%arg0: i32, %arg1: i32, %arg2: i32) -> (i32, i32, i32) {
    %c1_i32 = arith.constant 1 : i32
    %0 = arith.muli %arg0, %c1_i32 : i32
    %1 = arith.addi %0, %arg2 : i32
    %c0_i32 = arith.constant 0 : i32
    %c0_i32_0 = arith.constant 0 : i32
    return %arg1, %c0_i32, %1 : i32, i32, i32
  }
  func.func @transform_1(%arg0: i32, %arg1: i32, %arg2: i32) -> (i32, i32, i32, i32) {
    %c0_i32 = arith.constant 0 : i32
    %c0_i32_0 = arith.constant 0 : i32
    %c0_i32_1 = arith.constant 0 : i32
    return %arg0, %arg1, %c0_i32, %c0_i32_0 : i32, i32, i32, i32
  }
}

</mosaic_0001>

<bundles_post_ra>
// kernel: tpu_custom_call.1
= control target key start
LH: loop header
LB: loop body
LE: loop exit
PB: predicated region body
PF: predicated region fallthrough
CT: control target
= control target key end

     0   :  { %6 = vsyncpa [#allocation3], 0  ;;  %s855_s0 = inlined_call_operand.hbm [shape: f32[2,16,256], index: 0, kind: input, shape index: {}]   ;;  %s856_s1 = inlined_call_operand.hbm [shape: f32[1,2,1,16], index: 1, kind: output, shape index: {}]  }
   0x1   :  { %8 = vsyncpa [#allocation3 + $0x1], 0 }
   0x2   :  { %9 = vsyncpa [#allocation4], 0 }
   0x3   :  { %11 = vsyncpa [#allocation4 + $0x1], 0  ;;  %s689_s6 = smov 0   ;;  %s691_s7 = smov 0  }
   0x4   :  { %s693_s8 = smov 0   ;;  %s695_s9 = smov 0  }
   0x5   :  { %s697_s10 = smov 0   ;;  %s699_s11 = smov 0  }
   0x6 LB: > { %s480_s12 = sadd.s32 4294967295, %s670_s11   ;;  %s481_s13 = sadd.s32 4294967294, %s670_s11   ;;  %s670_s11 = sphi %s699_s11, %s17_s11   ;;  %s666_s10 = sphi %s697_s10, %s867_s10   ;;  %s662_s9 = sphi %s695_s9, %s866_s9   ;;  %s658_s8 = sphi %s693_s8, %s865_s8   ;;  %s654_s7 = sphi %s691_s7, %s864_s7   ;;  %s650_s6 = sphi %s689_s6, %s863_s6  }
   0x7   : > { %s32_s14 = sadd.s32 1, %s666_s10  ;;  %s47_s15 = sadd.s32 1, %s658_s8 }
   0x8   : > { %p34_p0 = scmp.ge.s32.totalorder %s32_s14, 2  ;;  %p54_p1 = scmp.ne.s32.totalorder %s658_s8, %s654_s7 }
   0x9   : > { %p55_p2 = scmp.eq.s32.totalorder %s670_s11, 0  ;;  %p60_p3 = scmp.ne.s32.totalorder %s654_s7, %s650_s6 }
   0xa   : > { %s869_s14 = smov (%p34_p0, %s32_s14), 0  ;;  %p61_p5 = scmp.eq.s32.totalorder %s480_s12, 0 }
   0xb   : > { %p730_p4 = por %p55_p2, %p54_p1  ;;  %s42_s17 = ssub.s32 %s666_s10, %s869_s14 }
   0xc   : > { %p86_p6 = scmp.eq.s32.totalorder %s480_s12, 1  ;;  %p45_p7 = scmp.eq.s32.totalorder %s42_s17, 0 }
   0xd   : > { %p736_p8 = por %p61_p5, %p60_p3  ;;  %p92_p10 = scmp.eq.s32.totalorder %s481_s13, 1 }
   0xe   : > { %p740_p9 = por %p86_p6, %p54_p1  ;;  %p505_p13 = scmp.lt.s32.totalorder %s670_s11, 2 }
   0xf   : > { %s745_s20 = scalar_select %p45_p7, %s658_s8, %s47_s15  }
  0x10   : > { %p747_p11 = por %p92_p10, %p60_p3  ;;  %s112_s22 = sand.u32 1, %s658_s8  }
  0x11   : > { %s484_s23 = sshll.u32 %s112_s22, 5  ;;  %s492_s24 = sshll.u32 %s666_s10, 9 }
  0x12   : > { %s125_s27 = scalar_lea.hbm %s855_s0, %s492_s24  ;;  %s116_s28 = scalar_lea.vmem [#allocation2], %s484_s23 }
  0x13   : > { %s126_s29 = sshll.u32 %s116_s28, 4  ;;  %p760_p0 = pnand %p505_p13, %p730_p4  ;;  %s127_s29 = int_to_ptr.vmem [resolvable:$true] %s126_s29 }
  0x14   : > { %p487_p1 = scmp.ge.s32.totalorder %s670_s11, 1  ;;  %s113_s2 = scalar_lea.sflag [#allocation3], %s112_s22 }
  0x15   : > { %p564_p2 = pneg %p760_p0  ;;  %s575_s3 = scalar_lea.vmem %s127_s29, 512 }
  0x16   : > { %p576_p3 = scmp.ne.s32.totalorder %s127_s29, %s575_s3  ;;  %s672_s4 = smov [#allocation2]  }
  0x17   : > { %s580_s5 = sshll.u32 %s672_s4, 4  ;;  %s581_s5 = int_to_ptr.vmem [resolvable:$false] %s580_s5 }
  0x18   : > { %p578_p5 = pnand %p576_p3, %p564_p2  ;;  %s582_s12 = scalar_lea.vmem %s581_s5, 1024 }
  0x19   : > { %p583_p7 = scmp.lt.s32.totalorder %s127_s29, %s581_s5  ;;  %p584_p10 = scmp.lt.s32.totalorder %s582_s12, %s575_s3 }
  0x1a   : > { %p579_p6 = pneg %p578_p5 }
  0x1b   : > { %p585_p12 = por %p584_p10, %p583_p7 }
  0x1d   : > { %p586_p4 = pnand %p585_p12, %p579_p6 }
  0x1f   : > { %589 = shalt.err (!%p586_p4)
}
  0x20   : > { %s673_s13 = smov 256   ;;  %s674_s15 = smov 16  }
  0x21   : > { %500 = dma.hbm_to_vmem [thread:$0]  (!%p760_p0), %s125_s27, 512, %s127_s29, %s113_s2, %s673_s13, %s673_s13, %s674_s15  }
  0x22   : > { %p134_p13 = scmp.lt.s32.totalorder %s670_s11, 3 }
  0x24   : > { %p135_p2 = pnand %p487_p1, %p134_p13 }
  0x25   : > { %s773_s16 = sand.u32 (!%p135_p2), 1, %s654_s7  }
  0x26   : > { %138 = sbr.rel (%p135_p2) target bundleno = 350 (0x15e), region = 24  ;;  %s488_s17 = sshll.u32 (!%p135_p2), %s773_s16, 5 }
  0x27   : > { %s141_s22 = scalar_lea.sflag (!%p135_p2), [#allocation3], %s773_s16  ;;  %s144_s23 = scalar_lea.vmem (!%p135_p2), [#allocation2], %s488_s17 }
  0x2b   : > { %641 = dma.done.wait (%p736_p8), %s141_s22, 512  }
  0x2c   : > { %643 = vsyncadd (%p736_p8), %s141_s22, 4294966784  ;;  %v170_v0 = vld [vmem:[%s144_s23] sm:$0xff]  ;;  %v171_v1 = vld [vmem:[%s144_s23 + $0x8] sm:$0xff]  ;;  %v675_v6 = vmov 0   ;;  %v183_v7 = vlaneseq  ;;  %v676_v8 = vmov 1966171168  }
  0x2d   : > { %v172_v2 = vld [vmem:[%s144_s23 + $0x10] sm:$0xff]  ;;  %v175_v3 = vadd.f32 %v171_v1, %v170_v0  ;;  %v173_v4 = vld [vmem:[%s144_s23 + $0x18] sm:$0xff]  ;;  %560 = vset.pattern.permute.xlu1 %v675_v6  ;;  %561 = vset.pattern.permute.xlu0 %v675_v6  ;;  %v252_v9 = vunpack.c.l.s4 %v676_v8  ;;  %vm168_vm0 = vcmask 122880   ;;  %s161_s18 = scalar_lea.vmem [#allocation5], %s773_s16  ;;  %v677_v61 = vmov 0.0   ;;  %s489_s24 = sshll.u32 %s662_s9, 4 }
  0x2e   : > { %v178_v5 = vadd.f32 %v173_v4, %v172_v2  ;;  %v782_v10 = vshrl.u32 %v183_v7, 7  ;;  %169 = vst.msk [vmem:[%s161_s18] sm:$0x1] %vm168_vm0, %v677_v61  ;;  %v352_v2 = vand.u32 127, %v183_v7  ;;  %vm362_vm1 = vcmask 130112   ;;  %s397_s25 = sshll.u32 %s161_s18, 4  ;;  %s395_s28 = scalar_lea.hbm %s856_s1, %s489_s24  ;;  %s398_s25 = int_to_ptr.vmem [resolvable:$true] %s397_s25 }
  0x2f   : > { %176 = vadd.xlane.f32.xlu0 %v175_v3  ;;  %v253_v11 = vunpack.c.0.s8 %v252_v9  ;;  %s383_s29 = scalar_lea.sflag [#allocation4], %s773_s16  ;;  %s590_s30 = scalar_lea.vmem %s398_s25, 16 }
  0x30   : > { %v185_v12 = vsub.s32 0, %v782_v10  ;;  %v189_v13 = vsub.s32 1, %v782_v10  ;;  %v193_v14 = vsub.s32 2, %v782_v10  ;;  %v197_v15 = vsub.s32 3, %v782_v10  ;;  %p591_p8 = scmp.ne.s32.totalorder %s398_s25, %s590_s30  ;;  %s678_s2 = smov [#allocation5]  }
  0x31   : > { %v201_v16 = vsub.s32 4, %v782_v10  ;;  %v205_v17 = vsub.s32 5, %v782_v10  ;;  %v209_v18 = vsub.s32 6, %v782_v10  ;;  %v213_v19 = vsub.s32 7, %v782_v10  ;;  %s594_s3 = sshll.u32 %s678_s2, 4  ;;  %s595_s3 = int_to_ptr.vmem [resolvable:$false] %s594_s3 }
  0x32   : > { %v793_v21 = vsub.s32 %v253_v11, %v782_v10  ;;  %v357_v3 = vadd.s32 4294967288, %v352_v2  ;;  %p592_p12 = pnand %p591_p8, %p740_p9  ;;  %s596_s9 = scalar_lea.vmem %s595_s3, 32 }
  0x33   : > { %179 = vadd.xlane.f32.xlu0 %v178_v5  ;;  %v355_v5 = vsub.s32 %v352_v2, %v782_v10  ;;  %p597_p1 = scmp.lt.s32.totalorder %s398_s25, %s595_s3  ;;  %p598_p3 = scmp.lt.s32.totalorder %s596_s9, %s590_s30 }
  0x34   : > { %v360_v6 = vsub.s32 %v357_v3, %v782_v10  ;;  %p593_p0 = pneg %p592_p12 }
  0x35   : > { %p599_p5 = por %p598_p3, %p597_p1 }
  0x37   : > { %p600_p6 = pnand %p599_p5, %p593_p0 }
  0xb8   : > { %v177_v20 = vpop.xlane.xlu0 %176 }
  0xb9   : > { %v186_v22 = vrot.slane %v177_v20, %v185_v12  ;;  %v190_v23 = vrot.slane %v177_v20, %v189_v13  ;;  %v194_v24 = vrot.slane %v177_v20, %v193_v14  ;;  %v198_v25 = vrot.slane %v177_v20, %v197_v15 }
  0xba   : > { %v202_v26 = vrot.slane %v177_v20, %v201_v16  ;;  %v206_v27 = vrot.slane %v177_v20, %v205_v17  ;;  %v210_v28 = vrot.slane %v177_v20, %v209_v18  ;;  %v214_v29 = vrot.slane %v177_v20, %v213_v19 }
  0xbb   : > { %v247_v30 = vcombine.low %v186_v22, %v190_v23  ;;  %v248_v31 = vcombine.low %v194_v24, %v198_v25 }
  0xbc   : > { %v180_v32 = vpop.xlane.xlu0 %179  ;;  %v249_v33 = vcombine.low %v202_v26, %v206_v27  ;;  %v250_v34 = vcombine.low %v210_v28, %v214_v29 }
  0xbd   : > { %v257_v35 = vrot.slane %v247_v30, %v793_v21  ;;  %v264_v36 = vrot.slane %v248_v31, %v793_v21  ;;  %v218_v37 = vrot.slane %v180_v32, %v185_v12  ;;  %v222_v38 = vrot.slane %v180_v32, %v189_v13 }
  0xbe   : > { %v271_v39 = vrot.slane %v249_v33, %v793_v21  ;;  %v278_v40 = vrot.slane %v250_v34, %v793_v21  ;;  %v226_v41 = vrot.slane %v180_v32, %v193_v14  ;;  %v230_v42 = vrot.slane %v180_v32, %v197_v15  ;;  %v174_v14 = vld [vmem:[%s161_s18] sm:$0x1] }
  0xbf   : > { %v279_v43 = vcombine.low %v257_v35, %v264_v36  ;;  %v234_v44 = vrot.slane %v180_v32, %v201_v16  ;;  %v238_v45 = vrot.slane %v180_v32, %v205_v17  ;;  %v242_v46 = vrot.slane %v180_v32, %v209_v18 }
  0xc0   : > { %v280_v47 = vcombine.low %v271_v39, %v278_v40  ;;  %v246_v48 = vrot.slane %v180_v32, %v213_v19  ;;  %v296_v49 = vcombine.low %v218_v37, %v222_v38  ;;  %v297_v50 = vcombine.low %v226_v41, %v230_v42 }
  0xc1   : > { %v287_v51 = vrot.slane %v279_v43, %v793_v21  ;;  %v298_v52 = vcombine.low %v234_v44, %v238_v45 }
  0xc2   : > { %v294_v53 = vrot.slane %v280_v47, %v793_v21  ;;  %v299_v54 = vcombine.low %v242_v46, %v246_v48  ;;  %v306_v55 = vrot.slane %v296_v49, %v793_v21  ;;  %v313_v56 = vrot.slane %v297_v50, %v793_v21 }
  0xc3   : > { %v320_v57 = vrot.slane %v298_v52, %v793_v21 }
  0xc4   : > { %v295_v58 = vcombine.low %v287_v51, %v294_v53  ;;  %v327_v59 = vrot.slane %v299_v54, %v793_v21  ;;  %v328_v60 = vcombine.low %v306_v55, %v313_v56 }
  0xc6   : > { %346 = vperm.xlu1 %560, %v295_v58   ;;  %v329_v62 = vcombine.low %v320_v57, %v327_v59  ;;  %v336_v63 = vrot.slane %v328_v60, %v793_v21 }
  0xc8   : > { %v343_v0 = vrot.slane %v329_v62, %v793_v21 }
  0xca   : > { %v344_v1 = vcombine.low %v336_v63, %v343_v0 }
  0xcc   : > { %349 = vperm.xlu1 %560, %v344_v1  }
 0x141   : > { %v347_v4 = vpop.permute.xlu1 %346 }
 0x142   : > { %v356_v9 = vrot.slane %v347_v4, %v355_v5 }
 0x147   : > { %v350_v8 = vpop.permute.xlu1 %349 }
 0x148   : > { %v361_v11 = vrot.slane %v350_v8, %v360_v6 }
 0x14a   : > { %v363_v12 = vsel %vm362_vm1, %v361_v11, %v356_v9 }
 0x14b   : > { %v370_v13 = vrot.slane %v363_v12, %v793_v21 }
 0x14d   : > { %v377_v7 = vrot.slane %v370_v13, %v793_v21 }
 0x14f   : > { %v379_v15 = vadd.f32 %v377_v7, %v174_v14 }
 0x151   : > { %381 = vst.msk [vmem:[%s161_s18] sm:$0x1] %vm168_vm0, %v379_v15 }
 0x152   : > { %603 = shalt.err (!%p600_p6)
}
 0x153   : > { %s604_s4 = scalar_lea.hbm %s395_s28, 16  ;;  %s608_s13 = scalar_lea.hbm %s856_s1, 32 }
 0x154   : > { %p605_p7 = scmp.ne.s32.totalorder %s395_s28, %s604_s4  ;;  %p609_p13 = scmp.lt.s32.totalorder %s395_s28, %s856_s1 }
 0x155   : > { %p610_p2 = scmp.lt.s32.totalorder %s608_s13, %s604_s4 }
 0x156   : > { %p606_p10 = pnand %p605_p7, %p740_p9 }
 0x157   : > { %p611_p8 = por %p610_p2, %p609_p13 }
 0x158   : > { %p607_p4 = pneg %p606_p10 }
 0x15a   : > { %p612_p12 = pnand %p611_p8, %p607_p4 }
 0x15c   : > { %615 = shalt.err (!%p612_p12)
}
 0x15d   : > { %495 = dma.vmem_to_hbm [thread:$0]  (%p740_p9), %s398_s25, 16, %s395_s28, %s383_s29  }
 0x15e PF: > { %s409_s17 = sand.u32 1, %s650_s6   ;;  %p862_p0 = scmp.ge.s32.totalorder %s670_s11, 2 }
 0x15f   : > { %s410_s22 = scalar_lea.sflag [#allocation4], %s409_s17 }
 0x160   : > { %p502_p1 = pnand %p862_p0, %p747_p11 }
 0x162   : > { %p503_p3 = pneg %p502_p1 }
 0x164   : > { %645 = dma.done.wait (%p503_p3), %s410_s22, 16  }
 0x165   : > { %647 = vsyncadd (%p503_p3), %s410_s22, 4294967280  ;;  %s17_s11 = sadd.s32 1, %s670_s11   ;;  %s863_s6 = smov %s654_s7 }
 0x166   : > { %p14_p5 = scmp.ge.s32.totalorder %s17_s11, 4   ;;  %s864_s7 = smov %s658_s8 }
 0x167   : > { %s865_s8 = smov %s745_s20  ;;  %s866_s9 = smov %s666_s10 }
 0x168   : > { %s867_s10 = smov %s869_s14  ;;  %16 = sbr.rel (!%p14_p5) target bundleno = 6 (0x6), region = 73 }
 0x16d   :  { %414 = vsyncpa [#allocation3], 1 }
 0x16e   :  { %416 = vsyncpa [#allocation3 + $0x1], 1 }
 0x16f   :  { %417 = vsyncpa [#allocation4], 1 }
 0x170   :  { %419 = vsyncpa [#allocation4 + $0x1], 1 }

</bundles_post_ra>
